<compile_context>
chip_gen: v7x
topology: tpu7x:2x2x1
jax: 0.10.0
libtpu: 0.0.40
codegen_flags: <defaults>
</compile_context>

<pallas_src>
import math

import numpy as np
import jax
import jax.numpy as jnp
from jax.experimental import pallas as pl
from jax.experimental.pallas import tpu as pltpu


# ---------------------------------------------------------------------------
# Fused Pallas kernel: all CIN layers + fc-weight head contraction.
# ---------------------------------------------------------------------------
def make_cin_kernel(layer_cfgs, split_half):
    num_layers = len(layer_cfgs)

    def kernel(x_ref, p_ref, out_ref):
        x0 = x_ref[...].astype(jnp.float32)            # (F0, L), lane = b*E + e
        f0, L = x0.shape
        h = x0
        acc = jnp.zeros((1, L), jnp.float32)           # sum_d fc_w[d] * cat[d,:]

        for i, cfg in enumerate(layer_cfgs):
            cout, cin, ret = cfg["cout"], cfg["cin"], cfg["retained"]
            fh = cin // f0                              # == h.shape[0]
            w = p_ref[cfg["w_off"]:cfg["w_off"] + cout, 0:cin]     # (Cout, Cin)
            b = p_ref[cfg["b_off"]:cfg["b_off"] + cout, 0:1]       # (Cout, 1)

            # 1x1 Conv1d over channels == W @ t with t[a*Fh+b,:] = x0[a,:]*h[b,:].
            # Never materialize t: z = sum_a W_a @ (x0[a,:] * h)
            # (F0 small MXU pushes + one (Fh, L) VPU scale each; live set is
            # capped at (Cout, L) so L can grow without vreg spills).
            z = jnp.zeros((cout, L), jnp.float32)
            for a in range(f0):
                hs = x0[a:a + 1, :] * h                            # (Fh, L) VPU
                z = z + jnp.dot(w[:, a * fh:(a + 1) * fh], hs,
                                preferred_element_type=jnp.float32)
            z = jnp.maximum(z + b, 0.0)                            # (Cout, L)

            if split_half and i != num_layers - 1:
                c = cout // 2
                x_i, h = z[:c, :], z[c:, :]             # static sublane slices
            else:
                x_i, h = z, z

            # Fused head contribution: acc += sum_d fc_w_slice[d] * x_i[d, :]
            fcw = p_ref[cfg["f_off"]:cfg["f_off"] + ret, 0:1]      # (ret, 1)
            acc = acc + jnp.sum(fcw * x_i, axis=0, keepdims=True)

        out_ref[...] = acc.astype(out_ref.dtype)        # full-width lane store

    return kernel


# ---------------------------------------------------------------------------
# Parameter packing: one (8,128)-padded slab, static unpack offsets.
# ---------------------------------------------------------------------------
def _pack_params(conv_ws, conv_bs, fcw_parts):
    pad8 = lambda n: ((n + 7) // 8) * 8
    max_cin = max(w.shape[1] for w in conv_ws)
    C = max(128, ((max_cin + 127) // 128) * 128)

    cfgs, segs, row = [], [], 0
    for i in range(len(conv_ws)):
        cout, cin = conv_ws[i].shape
        ret = fcw_parts[i].shape[0]
        w_off, row = row, row + pad8(cout)
        b_off, row = row, row + pad8(cout)
        f_off, row = row, row + pad8(ret)
        cfgs.append(dict(w_off=w_off, b_off=b_off, f_off=f_off,
                         cout=cout, cin=cin, retained=ret))
        segs += [(w_off, conv_ws[i]),
                 (b_off, jnp.reshape(conv_bs[i], (cout, 1))),
                 (f_off, fcw_parts[i])]

    packed = jnp.zeros((pad8(row), C), jnp.float32)
    for off, arr in segs:
        arr = jnp.asarray(arr, jnp.float32)
        packed = packed.at[off:off + arr.shape[0], 0:arr.shape[1]].set(arr)
    return packed, cfgs


# ---------------------------------------------------------------------------
# Generation-aware batch tiling.
# ---------------------------------------------------------------------------
def _num_tensorcores():
    """2 TensorCores per device on v7x and v4/v5p megacore; 1 on v5e/v6e."""
    try:
        kind = jax.devices()[0].device_kind.lower()
    except Exception:
        return 1
    return 2 if any(tag in kind for tag in ("v7", "v4", "v5p")) else 1


def _pick_block_batch(batch, embed_dim, num_tc, max_lanes=1024):
    """Pick (batch tile Bt, padded batch).  Bt*E is always a multiple of 128
    (lane-dense, unmasked stores).  1-TC chips: one grid step when possible
    (the grid is a serial loop there).  2-TC chips: guarantee an even tile
    count >= 2 so both cores get work, then grow Bt toward max_lanes."""
    base = 128 // math.gcd(128, embed_dim)
    if num_tc >= 2:
        unit = 2 * base
        b_pad = ((batch + unit - 1) // unit) * unit
        bt = base
        while (bt * 2 * embed_dim <= max_lanes
               and b_pad % (bt * 2) == 0
               and (b_pad // (bt * 2)) >= 2
               and (b_pad // (bt * 2)) % 2 == 0):
            bt *= 2
        return bt, b_pad
    # Single TensorCore: minimize grid steps.
    b_pad = ((batch + base - 1) // base) * base
    max_bt = max(base, (max_lanes // embed_dim) // base * base)
    if b_pad <= max_bt:
        return b_pad, b_pad
    bt = max_bt
    return bt, ((batch + bt - 1) // bt) * bt


# ---------------------------------------------------------------------------
# Wrapper
# ---------------------------------------------------------------------------
def cin_forward(x, conv_ws, conv_bs, fc_w, fc_b, split_half=True):
    """x: (B, num_fields, embed_dim) -> (B, 1). Mirrors the PyTorch forward."""
    B, F0, E = x.shape
    num_layers = len(conv_ws)

    # Retained channel count per layer (after split_half) -> fc weight slices.
    retained = []
    for i, w in enumerate(conv_ws):
        cout = w.shape[0]
        retained.append(cout // 2 if (split_half and i != num_layers - 1) else cout)
    offs = np.concatenate([[0], np.cumsum(retained)])
    fcw_parts = [fc_w[0, offs[i]:offs[i + 1]].reshape(retained[i], 1)
                 for i in range(num_layers)]

    packed, cfgs = _pack_params(conv_ws, conv_bs, fcw_parts)

    num_tc = _num_tensorcores()
    bt, b_pad = _pick_block_batch(B, E, num_tc)
    if b_pad != B:
        x = jnp.pad(x, ((0, b_pad - B), (0, 0), (0, 0)))
    L = bt * E
    num_tiles = b_pad // bt

    # Lane-dense layout: (F0, b_pad*E), lane index = b*E + e (layout plumbing
    # done once in the wrapper so the kernel never relayouts).
    x_lanes = jnp.transpose(x, (1, 0, 2)).reshape(F0, b_pad * E)

    kernel = make_cin_kernel(cfgs, split_half)
    acc = pl.pallas_call(
        kernel,
        out_shape=jax.ShapeDtypeStruct((1, b_pad * E), jnp.float32),
        grid=(num_tiles,),
        in_specs=[pl.BlockSpec((F0, L), lambda i: (0, i)),
                  pl.BlockSpec(packed.shape, lambda i: (0, 0))],
        out_specs=pl.BlockSpec((1, L), lambda i: (0, i)),
        compiler_params=pltpu.CompilerParams(
            dimension_semantics=("parallel",)),
    )(x_lanes, packed)

    # Tiny head tail in the wrapper (on B*E floats): per-sample sum over E
    # lanes + fc bias.  Padded batch rows carry ReLU(bias) garbage but are
    # sliced off by [:B].
    pooled = acc.reshape(b_pad, E).sum(axis=1, keepdims=True)
    out = pooled + jnp.reshape(fc_b, (1, 1))
    return out[:B].astype(x.dtype)


# ---------------------------------------------------------------------------
# Pure-JAX reference (for correctness check)
# ---------------------------------------------------------------------------
def cin_reference(x, conv_ws, conv_bs, fc_w, fc_b, split_half=True):
    n = len(conv_ws)
    x0, h = x[:, :, None, :], x
    xs = []
    for i in range(n):
        t = x0 * h[:, None, :, :]                           # (B, F0, Fh, E)
        B, f0, fh, e = t.shape
        t = t.reshape(B, f0 * fh, e)
        z = jnp.einsum('oc,bce->boe', conv_ws[i], t) + conv_bs[i][None]
        z = jnp.maximum(z, 0.0)
        if split_half and i != n - 1:
            c = z.shape[1] // 2
            x_i, h = z[:, :c], z[:, c:]
        else:
            x_i, h = z, z
        xs.append(x_i)
    cat = jnp.concatenate(xs, axis=1)
    pooled = jnp.sum(cat, axis=2)
    return pooled @ fc_w.T + fc_b.reshape(1, 1)


# ---------------------------------------------------------------------------
# Main
# ---------------------------------------------------------------------------
if __name__ == "__main__":
    # Module-consistent shapes: batch=32 (module's batch_size), num_fields=4,
    # embed_dim=16, cross_layer_sizes=(16, 16, 8), split_half=True.
    B, F, E = 32, 4, 16
    cross_layer_sizes = (16, 16, 8)
    split_half = True
    num_layers = len(cross_layer_sizes)

    key = jax.random.PRNGKey(0)
    key, kx = jax.random.split(key)
    x = jax.random.normal(kx, (B, F, E), dtype=jnp.float32)

    # Deterministic parameter init matching the module's shapes.
    conv_ws, conv_bs = [], []
    prev_dim, fc_input_dim = F, 0
    for i in range(num_layers):
        cout = cross_layer_sizes[i]
        cin = F * prev_dim
        key, kw, kb = jax.random.split(key, 3)
        conv_ws.append(0.1 * jax.random.normal(kw, (cout, cin), dtype=jnp.float32))
        conv_bs.append(0.1 * jax.random.normal(kb, (cout, 1), dtype=jnp.float32))
        if split_half and i != num_layers - 1:
            cout = cout // 2
        prev_dim = cout
        fc_input_dim += prev_dim

    key, kfw, kfb = jax.random.split(key, 3)
    fc_w = 0.1 * jax.random.normal(kfw, (1, fc_input_dim), dtype=jnp.float32)
    fc_b = 0.1 * jax.random.normal(kfb, (1, 1), dtype=jnp.float32)

    out = cin_forward(x, conv_ws, conv_bs, fc_w, fc_b, split_half=split_half)
    out = jax.block_until_ready(out)

    ref = cin_reference(x, conv_ws, conv_bs, fc_w, fc_b, split_half=split_half)
    assert out.shape == (B, 1), out.shape
    assert np.allclose(np.asarray(out), np.asarray(ref), atol=1e-4, rtol=1e-4), \
        (np.asarray(out), np.asarray(ref))

    print("KERNEL_OK")
</pallas_src>

<mosaic_0001>
module attributes {stable_mosaic.version = 11 : i64} {
  func.func @kernel(%arg0: i32, %arg1: memref<4x512xf32, #tpu.memory_space<vmem>>, %arg2: memref<104x128xf32, #tpu.memory_space<vmem>>, %arg3: memref<1x512xf32, #tpu.memory_space<vmem>>) attributes {dimension_semantics = [#tpu.dimension_semantics<parallel>], iteration_bounds = array<i64: 1>, scalar_prefetch = 0 : i64, scratch_operands = 0 : i64, tpu.core_type = #tpu.core_type<tc>, window_params = [{transform_indices = @transform_0, window_bounds = array<i64: 4, 512>}, {pipeline_mode = #tpu.pipeline_mode<synchronous>, transform_indices = @transform_1, window_bounds = array<i64: 104, 128>}, {transform_indices = @transform_2, window_bounds = array<i64: 1, 512>}]} {
    %c0 = arith.constant 0 : index
    %c0_0 = arith.constant 0 : index
    %0 = vector.load %arg1[%c0, %c0_0] : memref<4x512xf32, #tpu.memory_space<vmem>>, vector<4x512xf32>
    %cst = arith.constant 0.000000e+00 : f32
    %1 = vector.broadcast %cst : f32 to vector<1x512xf32>
    %c0_1 = arith.constant 0 : index
    %c0_2 = arith.constant 0 : index
    %2 = vector.load %arg2[%c0_1, %c0_2] : memref<104x128xf32, #tpu.memory_space<vmem>>, vector<16x16xf32>
    %c16 = arith.constant 16 : index
    %c0_3 = arith.constant 0 : index
    %3 = vector.load %arg2[%c16, %c0_3] : memref<104x128xf32, #tpu.memory_space<vmem>>, vector<16x1xf32>
    %cst_4 = arith.constant 0.000000e+00 : f32
    %4 = vector.broadcast %cst_4 : f32 to vector<16x512xf32>
    %5 = vector.extract_strided_slice %0 {offsets = [0, 0], sizes = [1, 512], strides = [1, 1]} : vector<4x512xf32> to vector<1x512xf32>
    %6 = vector.broadcast %5 : vector<1x512xf32> to vector<4x512xf32>
    %7 = arith.mulf %6, %0 : vector<4x512xf32>
    %8 = vector.extract_strided_slice %2 {offsets = [0, 0], sizes = [16, 4], strides = [1, 1]} : vector<16x16xf32> to vector<16x4xf32>
    %cst_5 = arith.constant dense<0.000000e+00> : vector<16x512xf32>
    %9 = tpu.matmul %8, %7, %cst_5 {dimension_numbers = #tpu.dot_dimension_numbers<[1], [0], [0], [1], [0, 0, 1, 1], [], []>} : vector<16x4xf32>, vector<4x512xf32>, vector<16x512xf32> -> vector<16x512xf32>
    %10 = arith.addf %4, %9 : vector<16x512xf32>
    %11 = vector.extract_strided_slice %0 {offsets = [1, 0], sizes = [1, 512], strides = [1, 1]} : vector<4x512xf32> to vector<1x512xf32>
    %12 = vector.broadcast %11 : vector<1x512xf32> to vector<4x512xf32>
    %13 = arith.mulf %12, %0 : vector<4x512xf32>
    %14 = vector.extract_strided_slice %2 {offsets = [0, 4], sizes = [16, 4], strides = [1, 1]} : vector<16x16xf32> to vector<16x4xf32>
    %cst_6 = arith.constant dense<0.000000e+00> : vector<16x512xf32>
    %15 = tpu.matmul %14, %13, %cst_6 {dimension_numbers = #tpu.dot_dimension_numbers<[1], [0], [0], [1], [0, 0, 1, 1], [], []>} : vector<16x4xf32>, vector<4x512xf32>, vector<16x512xf32> -> vector<16x512xf32>
    %16 = arith.addf %10, %15 : vector<16x512xf32>
    %17 = vector.extract_strided_slice %0 {offsets = [2, 0], sizes = [1, 512], strides = [1, 1]} : vector<4x512xf32> to vector<1x512xf32>
    %18 = vector.broadcast %17 : vector<1x512xf32> to vector<4x512xf32>
    %19 = arith.mulf %18, %0 : vector<4x512xf32>
    %20 = vector.extract_strided_slice %2 {offsets = [0, 8], sizes = [16, 4], strides = [1, 1]} : vector<16x16xf32> to vector<16x4xf32>
    %cst_7 = arith.constant dense<0.000000e+00> : vector<16x512xf32>
    %21 = tpu.matmul %20, %19, %cst_7 {dimension_numbers = #tpu.dot_dimension_numbers<[1], [0], [0], [1], [0, 0, 1, 1], [], []>} : vector<16x4xf32>, vector<4x512xf32>, vector<16x512xf32> -> vector<16x512xf32>
    %22 = arith.addf %16, %21 : vector<16x512xf32>
    %23 = vector.extract_strided_slice %0 {offsets = [3, 0], sizes = [1, 512], strides = [1, 1]} : vector<4x512xf32> to vector<1x512xf32>
    %24 = vector.broadcast %23 : vector<1x512xf32> to vector<4x512xf32>
    %25 = arith.mulf %24, %0 : vector<4x512xf32>
    %26 = vector.extract_strided_slice %2 {offsets = [0, 12], sizes = [16, 4], strides = [1, 1]} : vector<16x16xf32> to vector<16x4xf32>
    %cst_8 = arith.constant dense<0.000000e+00> : vector<16x512xf32>
    %27 = tpu.matmul %26, %25, %cst_8 {dimension_numbers = #tpu.dot_dimension_numbers<[1], [0], [0], [1], [0, 0, 1, 1], [], []>} : vector<16x4xf32>, vector<4x512xf32>, vector<16x512xf32> -> vector<16x512xf32>
    %28 = arith.addf %22, %27 : vector<16x512xf32>
    %29 = vector.broadcast %3 : vector<16x1xf32> to vector<16x512xf32>
    %30 = arith.addf %28, %29 : vector<16x512xf32>
    %cst_9 = arith.constant 0.000000e+00 : f32
    %31 = vector.broadcast %cst_9 : f32 to vector<16x512xf32>
    %32 = arith.maximumf %30, %31 : vector<16x512xf32>
    %33 = vector.extract_strided_slice %32 {offsets = [0, 0], sizes = [8, 512], strides = [1, 1]} : vector<16x512xf32> to vector<8x512xf32>
    %34 = vector.extract_strided_slice %32 {offsets = [8, 0], sizes = [8, 512], strides = [1, 1]} : vector<16x512xf32> to vector<8x512xf32>
    %c32 = arith.constant 32 : index
    %c0_10 = arith.constant 0 : index
    %35 = vector.load %arg2[%c32, %c0_10] : memref<104x128xf32, #tpu.memory_space<vmem>>, vector<8x1xf32>
    %36 = vector.broadcast %35 : vector<8x1xf32> to vector<8x512xf32>
    %37 = arith.mulf %36, %33 : vector<8x512xf32>
    %cst_11 = arith.constant dense<0.000000e+00> : vector<512xf32>
    %38 = vector.multi_reduction <add>, %37, %cst_11 [0] : vector<8x512xf32> to vector<512xf32>
    %39 = vector.shape_cast %38 : vector<512xf32> to vector<1x512xf32>
    %40 = arith.addf %1, %39 : vector<1x512xf32>
    %c40 = arith.constant 40 : index
    %c0_12 = arith.constant 0 : index
    %41 = vector.load %arg2[%c40, %c0_12] : memref<104x128xf32, #tpu.memory_space<vmem>>, vector<16x32xf32>
    %c56 = arith.constant 56 : index
    %c0_13 = arith.constant 0 : index
    %42 = vector.load %arg2[%c56, %c0_13] : memref<104x128xf32, #tpu.memory_space<vmem>>, vector<16x1xf32>
    %cst_14 = arith.constant 0.000000e+00 : f32
    %43 = vector.broadcast %cst_14 : f32 to vector<16x512xf32>
    %44 = vector.extract_strided_slice %0 {offsets = [0, 0], sizes = [1, 512], strides = [1, 1]} : vector<4x512xf32> to vector<1x512xf32>
    %45 = vector.broadcast %44 : vector<1x512xf32> to vector<8x512xf32>
    %46 = arith.mulf %45, %34 : vector<8x512xf32>
    %47 = vector.extract_strided_slice %41 {offsets = [0, 0], sizes = [16, 8], strides = [1, 1]} : vector<16x32xf32> to vector<16x8xf32>
    %cst_15 = arith.constant dense<0.000000e+00> : vector<16x512xf32>
    %48 = tpu.matmul %47, %46, %cst_15 {dimension_numbers = #tpu.dot_dimension_numbers<[1], [0], [0], [1], [0, 0, 1, 1], [], []>} : vector<16x8xf32>, vector<8x512xf32>, vector<16x512xf32> -> vector<16x512xf32>
    %49 = arith.addf %43, %48 : vector<16x512xf32>
    %50 = vector.extract_strided_slice %0 {offsets = [1, 0], sizes = [1, 512], strides = [1, 1]} : vector<4x512xf32> to vector<1x512xf32>
    %51 = vector.broadcast %50 : vector<1x512xf32> to vector<8x512xf32>
    %52 = arith.mulf %51, %34 : vector<8x512xf32>
    %53 = vector.extract_strided_slice %41 {offsets = [0, 8], sizes = [16, 8], strides = [1, 1]} : vector<16x32xf32> to vector<16x8xf32>
    %cst_16 = arith.constant dense<0.000000e+00> : vector<16x512xf32>
    %54 = tpu.matmul %53, %52, %cst_16 {dimension_numbers = #tpu.dot_dimension_numbers<[1], [0], [0], [1], [0, 0, 1, 1], [], []>} : vector<16x8xf32>, vector<8x512xf32>, vector<16x512xf32> -> vector<16x512xf32>
    %55 = arith.addf %49, %54 : vector<16x512xf32>
    %56 = vector.extract_strided_slice %0 {offsets = [2, 0], sizes = [1, 512], strides = [1, 1]} : vector<4x512xf32> to vector<1x512xf32>
    %57 = vector.broadcast %56 : vector<1x512xf32> to vector<8x512xf32>
    %58 = arith.mulf %57, %34 : vector<8x512xf32>
    %59 = vector.extract_strided_slice %41 {offsets = [0, 16], sizes = [16, 8], strides = [1, 1]} : vector<16x32xf32> to vector<16x8xf32>
    %cst_17 = arith.constant dense<0.000000e+00> : vector<16x512xf32>
    %60 = tpu.matmul %59, %58, %cst_17 {dimension_numbers = #tpu.dot_dimension_numbers<[1], [0], [0], [1], [0, 0, 1, 1], [], []>} : vector<16x8xf32>, vector<8x512xf32>, vector<16x512xf32> -> vector<16x512xf32>
    %61 = arith.addf %55, %60 : vector<16x512xf32>
    %62 = vector.extract_strided_slice %0 {offsets = [3, 0], sizes = [1, 512], strides = [1, 1]} : vector<4x512xf32> to vector<1x512xf32>
    %63 = vector.broadcast %62 : vector<1x512xf32> to vector<8x512xf32>
    %64 = arith.mulf %63, %34 : vector<8x512xf32>
    %65 = vector.extract_strided_slice %41 {offsets = [0, 24], sizes = [16, 8], strides = [1, 1]} : vector<16x32xf32> to vector<16x8xf32>
    %cst_18 = arith.constant dense<0.000000e+00> : vector<16x512xf32>
    %66 = tpu.matmul %65, %64, %cst_18 {dimension_numbers = #tpu.dot_dimension_numbers<[1], [0], [0], [1], [0, 0, 1, 1], [], []>} : vector<16x8xf32>, vector<8x512xf32>, vector<16x512xf32> -> vector<16x512xf32>
    %67 = arith.addf %61, %66 : vector<16x512xf32>
    %68 = vector.broadcast %42 : vector<16x1xf32> to vector<16x512xf32>
    %69 = arith.addf %67, %68 : vector<16x512xf32>
    %cst_19 = arith.constant 0.000000e+00 : f32
    %70 = vector.broadcast %cst_19 : f32 to vector<16x512xf32>
    %71 = arith.maximumf %69, %70 : vector<16x512xf32>
    %72 = vector.extract_strided_slice %71 {offsets = [0, 0], sizes = [8, 512], strides = [1, 1]} : vector<16x512xf32> to vector<8x512xf32>
    %73 = vector.extract_strided_slice %71 {offsets = [8, 0], sizes = [8, 512], strides = [1, 1]} : vector<16x512xf32> to vector<8x512xf32>
    %c72 = arith.constant 72 : index
    %c0_20 = arith.constant 0 : index
    %74 = vector.load %arg2[%c72, %c0_20] : memref<104x128xf32, #tpu.memory_space<vmem>>, vector<8x1xf32>
    %75 = vector.broadcast %74 : vector<8x1xf32> to vector<8x512xf32>
    %76 = arith.mulf %75, %72 : vector<8x512xf32>
    %cst_21 = arith.constant dense<0.000000e+00> : vector<512xf32>
    %77 = vector.multi_reduction <add>, %76, %cst_21 [0] : vector<8x512xf32> to vector<512xf32>
    %78 = vector.shape_cast %77 : vector<512xf32> to vector<1x512xf32>
    %79 = arith.addf %40, %78 : vector<1x512xf32>
    %c80 = arith.constant 80 : index
    %c0_22 = arith.constant 0 : index
    %80 = vector.load %arg2[%c80, %c0_22] : memref<104x128xf32, #tpu.memory_space<vmem>>, vector<8x32xf32>
    %c88 = arith.constant 88 : index
    %c0_23 = arith.constant 0 : index
    %81 = vector.load %arg2[%c88, %c0_23] : memref<104x128xf32, #tpu.memory_space<vmem>>, vector<8x1xf32>
    %cst_24 = arith.constant 0.000000e+00 : f32
    %82 = vector.broadcast %cst_24 : f32 to vector<8x512xf32>
    %83 = vector.extract_strided_slice %0 {offsets = [0, 0], sizes = [1, 512], strides = [1, 1]} : vector<4x512xf32> to vector<1x512xf32>
    %84 = vector.broadcast %83 : vector<1x512xf32> to vector<8x512xf32>
    %85 = arith.mulf %84, %73 : vector<8x512xf32>
    %86 = vector.extract_strided_slice %80 {offsets = [0, 0], sizes = [8, 8], strides = [1, 1]} : vector<8x32xf32> to vector<8x8xf32>
    %cst_25 = arith.constant dense<0.000000e+00> : vector<8x512xf32>
    %87 = tpu.matmul %86, %85, %cst_25 {dimension_numbers = #tpu.dot_dimension_numbers<[1], [0], [0], [1], [0, 0, 1, 1], [], []>} : vector<8x8xf32>, vector<8x512xf32>, vector<8x512xf32> -> vector<8x512xf32>
    %88 = arith.addf %82, %87 : vector<8x512xf32>
    %89 = vector.extract_strided_slice %0 {offsets = [1, 0], sizes = [1, 512], strides = [1, 1]} : vector<4x512xf32> to vector<1x512xf32>
    %90 = vector.broadcast %89 : vector<1x512xf32> to vector<8x512xf32>
    %91 = arith.mulf %90, %73 : vector<8x512xf32>
    %92 = vector.extract_strided_slice %80 {offsets = [0, 8], sizes = [8, 8], strides = [1, 1]} : vector<8x32xf32> to vector<8x8xf32>
    %cst_26 = arith.constant dense<0.000000e+00> : vector<8x512xf32>
    %93 = tpu.matmul %92, %91, %cst_26 {dimension_numbers = #tpu.dot_dimension_numbers<[1], [0], [0], [1], [0, 0, 1, 1], [], []>} : vector<8x8xf32>, vector<8x512xf32>, vector<8x512xf32> -> vector<8x512xf32>
    %94 = arith.addf %88, %93 : vector<8x512xf32>
    %95 = vector.extract_strided_slice %0 {offsets = [2, 0], sizes = [1, 512], strides = [1, 1]} : vector<4x512xf32> to vector<1x512xf32>
    %96 = vector.broadcast %95 : vector<1x512xf32> to vector<8x512xf32>
    %97 = arith.mulf %96, %73 : vector<8x512xf32>
    %98 = vector.extract_strided_slice %80 {offsets = [0, 16], sizes = [8, 8], strides = [1, 1]} : vector<8x32xf32> to vector<8x8xf32>
    %cst_27 = arith.constant dense<0.000000e+00> : vector<8x512xf32>
    %99 = tpu.matmul %98, %97, %cst_27 {dimension_numbers = #tpu.dot_dimension_numbers<[1], [0], [0], [1], [0, 0, 1, 1], [], []>} : vector<8x8xf32>, vector<8x512xf32>, vector<8x512xf32> -> vector<8x512xf32>
    %100 = arith.addf %94, %99 : vector<8x512xf32>
    %101 = vector.extract_strided_slice %0 {offsets = [3, 0], sizes = [1, 512], strides = [1, 1]} : vector<4x512xf32> to vector<1x512xf32>
    %102 = vector.broadcast %101 : vector<1x512xf32> to vector<8x512xf32>
    %103 = arith.mulf %102, %73 : vector<8x512xf32>
    %104 = vector.extract_strided_slice %80 {offsets = [0, 24], sizes = [8, 8], strides = [1, 1]} : vector<8x32xf32> to vector<8x8xf32>
    %cst_28 = arith.constant dense<0.000000e+00> : vector<8x512xf32>
    %105 = tpu.matmul %104, %103, %cst_28 {dimension_numbers = #tpu.dot_dimension_numbers<[1], [0], [0], [1], [0, 0, 1, 1], [], []>} : vector<8x8xf32>, vector<8x512xf32>, vector<8x512xf32> -> vector<8x512xf32>
    %106 = arith.addf %100, %105 : vector<8x512xf32>
    %107 = vector.broadcast %81 : vector<8x1xf32> to vector<8x512xf32>
    %108 = arith.addf %106, %107 : vector<8x512xf32>
    %cst_29 = arith.constant 0.000000e+00 : f32
    %109 = vector.broadcast %cst_29 : f32 to vector<8x512xf32>
    %110 = arith.maximumf %108, %109 : vector<8x512xf32>
    %c96 = arith.constant 96 : index
    %c0_30 = arith.constant 0 : index
    %111 = vector.load %arg2[%c96, %c0_30] : memref<104x128xf32, #tpu.memory_space<vmem>>, vector<8x1xf32>
    %112 = vector.broadcast %111 : vector<8x1xf32> to vector<8x512xf32>
    %113 = arith.mulf %112, %110 : vector<8x512xf32>
    %cst_31 = arith.constant dense<0.000000e+00> : vector<512xf32>
    %114 = vector.multi_reduction <add>, %113, %cst_31 [0] : vector<8x512xf32> to vector<512xf32>
    %115 = vector.shape_cast %114 : vector<512xf32> to vector<1x512xf32>
    %116 = arith.addf %79, %115 : vector<1x512xf32>
    %c0_32 = arith.constant 0 : index
    %c0_33 = arith.constant 0 : index
    %117 = vector.load %arg3[%c0_32, %c0_33] : memref<1x512xf32, #tpu.memory_space<vmem>>, vector<1x512xf32>
    tpu.vector_store %arg3[%c0_32, %c0_33], %116 {strides = array<i32>} : memref<1x512xf32, #tpu.memory_space<vmem>>, vector<1x512xf32>,
    return
  }
  func.func @transform_0(%arg0: i32) -> (i32, i32) {
    %c0_i32 = arith.constant 0 : i32
    %c0_i32_0 = arith.constant 0 : i32
    return %c0_i32, %arg0 : i32, i32
  }
  func.func @transform_1(%arg0: i32) -> (i32, i32) {
    %c0_i32 = arith.constant 0 : i32
    %c0_i32_0 = arith.constant 0 : i32
    %c0_i32_1 = arith.constant 0 : i32
    return %c0_i32, %c0_i32_0 : i32, i32
  }
  func.func @transform_2(%arg0: i32) -> (i32, i32) {
    %c0_i32 = arith.constant 0 : i32
    %c0_i32_0 = arith.constant 0 : i32
    return %c0_i32, %arg0 : i32, i32
  }
}

</mosaic_0001>

<bundles_post_ra>
// kernel: tpu_custom_call.1
= control target key start
LH: loop header
LB: loop body
LE: loop exit
PB: predicated region body
PF: predicated region fallthrough
CT: control target
= control target key end

     0   :  { %7 = vsyncpa [#allocation3], 0  ;;  %s3062_s0 = inlined_call_operand.hbm [shape: f32[4,512], index: 0, kind: input, shape index: {}]   ;;  %s3063_s1 = inlined_call_operand.hbm [shape: f32[104,128], index: 1, kind: input, shape index: {}]   ;;  %s3064_s2 = inlined_call_operand.hbm [shape: f32[1,512], index: 2, kind: output, shape index: {}]  }
   0x1   :  { %8 = vsyncpa [#allocation6], 0 }
   0x2   :  { %9 = vsyncpa [#allocation4], 0  ;;  %s2648_s9 = smov [#allocation2]   ;;  %s2649_s11 = smov [#allocation5]  }
   0x3   :  { %s16_s10 = sshll.u32 %s2648_s9, 4  ;;  %s25_s12 = sshll.u32 %s2649_s11, 4  ;;  %s17_s10 = int_to_ptr.vmem [resolvable:$true] %s16_s10  ;;  %s2676_s12 = int_to_ptr.vmem [resolvable:$true] %s25_s12 }
   0x4   :  { %s2576_s15 = scalar_lea.hbm %s3062_s0, 256 }
   0x5   :  { %p2577_p0 = scmp.ne.s32.totalorder %s3062_s0, %s2576_s15  ;;  %p2580_p1 = scmp.lt.u32.totalorder %s2576_s15, %s3062_s0 }
   0x7   :  { %p2582_p2 = pnand %p2580_p1, %p2577_p0 }
   0x9   :  { %2585 = shalt.err (!%p2582_p2)
}
   0xa   :  { %s2586_s20 = scalar_lea.vmem %s17_s10, 256  ;;  %p2591_p4 = scmp.lt.s32.totalorder %s17_s10, %s17_s10 }
   0xb   :  { %p2587_p3 = scmp.ne.s32.totalorder %s17_s10, %s2586_s20  ;;  %p2592_p5 = scmp.lt.s32.totalorder %s2586_s20, %s2586_s20 }
   0xd   :  { %p2593_p6 = por %p2592_p5, %p2591_p4 }
   0xf   :  { %p2594_p7 = pnand %p2593_p6, %p2587_p3 }
  0x11   :  { %2597 = shalt.err (!%p2594_p7)
}
  0x12   :  { %19 = dma.hbm_to_vmem [thread:$0]  %s3062_s0, 256, %s17_s10, [#allocation3]  }
  0x13   :  { %s2598_s25 = scalar_lea.hbm %s3063_s1, 1664 }
  0x14   :  { %p2599_p8 = scmp.ne.s32.totalorder %s3063_s1, %s2598_s25  ;;  %p2602_p9 = scmp.lt.u32.totalorder %s2598_s25, %s3063_s1 }
  0x16   :  { %p2604_p10 = pnand %p2602_p9, %p2599_p8 }
  0x18   :  { %2607 = shalt.err (!%p2604_p10)
}
  0x19   :  { %s2608_s30 = scalar_lea.vmem %s2676_s12, 1664  ;;  %p2613_p12 = scmp.lt.s32.totalorder %s2676_s12, %s2676_s12 }
  0x1a   :  { %p2609_p11 = scmp.ne.s32.totalorder %s2676_s12, %s2608_s30  ;;  %p2614_p13 = scmp.lt.s32.totalorder %s2608_s30, %s2608_s30 }
  0x1c   :  { %p2615_p0 = por %p2614_p13, %p2613_p12 }
  0x1e   :  { %p2616_p1 = pnand %p2615_p0, %p2609_p11 }
  0x20   :  { %2619 = shalt.err (!%p2616_p1)
}
  0x21   :  { %s2650_s0 = smov 128   ;;  %s2651_s3 = smov 8  }
  0x22   :  { %31 = dma.hbm_to_vmem [thread:$0]  %s3063_s1, 1664, %s2676_s12, [#allocation6], %s2650_s0, %s2650_s0, %s2651_s3  }
  0x23   :  { %2642 = dma.done.wait [#allocation3], 256  }
  0x24   :  { %2643 = vsyncadd [#allocation3], 4294967040 }
  0x25   :  { %2644 = dma.done.wait [#allocation6], 1664  }
  0x26   :  { %2645 = vsyncadd [#allocation6], 4294965632  ;;  %v46_v0 = vlaneseq  ;;  %v2652_v1 = vmov 0.0   ;;  %v2716_v7 = vld [vmem:[#allocation5] sm:$0xff]  ;;  %v2718_v8 = vld [vmem:[#allocation2] sm:$0xff]  ;;  %s2653_s1 = smov 124  }
  0x27   :  { %218 = vmatprep.mubr.f32.mxu0 %v2652_v1  ;;  %295 = vmatprep.mubr.f32.mxu1 %v2652_v1  ;;  %s2654_s6 = smov 120   ;;  %v2725_v9 = vcombine.high %v2718_v8, %v2718_v8  ;;  %vm141_vm0 = vcmask 1043456   ;;  %v2728_v11 = vld [vmem:[#allocation2 + $0x8] sm:$0xff]  ;;  %v2731_v13 = vld [vmem:[#allocation5 + $0x8] sm:$0xff]  ;;  %s2655_s7 = smov 116   ;;  %v2656_v37 = vmov 0  }
  0x28   :  { %v2710_v2 = vshrl.u32 %v46_v0, 7  ;;  %132 = vrot.lane.b32.xlu0 %v2716_v7, %s2653_s1  ;;  %518 = vrot.lane.b32.xlu1 %v2716_v7, %s2654_s6  ;;  %v2735_v14 = vcombine.high %v2728_v11, %v2728_v11  ;;  %v2782_v35 = vld [vmem:[#allocation5 + $0x28] sm:$0xff]  ;;  %v43_v36 = vld [vmem:[#allocation5 + $0x18] sm:$0xff]  ;;  %v2786_v38 = vld [vmem:[#allocation5 + $0x30] sm:$0xff]  ;;  %s2657_s8 = smov 112   ;;  %s2658_s9 = smov 104  }
  0x29   :  { %2572 = vset.pattern.permute.xlu0 %v2656_v37  ;;  %2573 = vset.pattern.permute.xlu1 %v2656_v37  ;;  %v989_v39 = vld [vmem:[#allocation5 + $0x40] sm:$0xff]  ;;  %v2794_v40 = vld [vmem:[#allocation5 + $0x50] sm:$0xff]  ;;  %v988_v42 = vld [vmem:[#allocation5 + $0x38] sm:$0xff]  ;;  %vm136_vm1 = vcmask 31744   ;;  %vm1004_vm2 = vcmask 64512   ;;  %s2660_s10 = smov [#allocation7]  }
  0x2a   :  { %v92_v3 = vsub.s32 1, %v2710_v2  ;;  %v96_v4 = vsub.s32 5, %v2710_v2  ;;  %v52_v5 = vsub.s32 4, %v2710_v2  ;;  %v48_v6 = vsub.s32 0, %v2710_v2  ;;  %v42_v41 = vld [vmem:[#allocation5 + $0x10] sm:$0xff]  ;;  %v1734_v43 = vld [vmem:[#allocation5 + $0x58] sm:$0xff] }
  0x2b   :  { %v948_v44 = vld [vmem:[#allocation5 + $0x20] sm:$0xff]  ;;  %v1695_v45 = vld [vmem:[#allocation5 + $0x48] sm:$0xff]  ;;  %v484_v46 = vsub.s32 6, %v2710_v2  ;;  %v480_v47 = vsub.s32 2, %v2710_v2  ;;  %v706_v52 = vsub.s32 7, %v2710_v2  ;;  %v702_v53 = vsub.s32 3, %v2710_v2 }
  0x2c   :  { %v97_v10 = vrot.slane %v2718_v8, %v96_v4  ;;  %v93_v12 = vrot.slane %v2718_v8, %v92_v3  ;;  %v105_v15 = vrot.slane %v2728_v11, %v96_v4  ;;  %v101_v16 = vrot.slane %v2728_v11, %v92_v3  ;;  %134 = vrot.lane.b32.xlu0 %v2731_v13, %s2653_s1  ;;  %s2433_s11 = sshll.u32 %s2660_s10, 4  ;;  %s2434_s11 = int_to_ptr.vmem [resolvable:$true] %s2433_s11 }
  0x2d   :  { %v53_v17 = vrot.slane %v2718_v8, %v52_v5  ;;  %v61_v20 = vrot.slane %v2728_v11, %v52_v5  ;;  %v49_v21 = vrot.slane %v2718_v8, %v48_v6  ;;  %v57_v25 = vrot.slane %v2728_v11, %v48_v6  ;;  %520 = vrot.lane.b32.xlu1 %v2731_v13, %s2654_s6  ;;  %s2620_s12 = scalar_lea.vmem %s2434_s11, 64  ;;  %p2625_p3 = scmp.lt.s32.totalorder %s2434_s11, %s2434_s11 }
  0x2e   :  { %v2740_v18 = vrot.slane %v97_v10, %v92_v3  ;;  %v2742_v19 = vrot.slane %v93_v12, %v92_v3  ;;  %v2746_v22 = vrot.slane %v105_v15, %v92_v3  ;;  %v2748_v23 = vrot.slane %v101_v16, %v92_v3  ;;  %p2621_p2 = scmp.ne.s32.totalorder %s2434_s11, %s2620_s12  ;;  %p2626_p4 = scmp.lt.s32.totalorder %s2620_s12, %s2620_s12 }
  0x2f   :  { %v2750_v24 = vrot.slane %v53_v17, %v48_v6  ;;  %v2760_v28 = vrot.slane %v61_v20, %v48_v6  ;;  %v2768_v32 = vrot.slane %v49_v21, %v48_v6  ;;  %v2773_v34 = vrot.slane %v57_v25, %v48_v6 }
  0x30   :  { %v127_v26 = vmul.f32 %v2740_v18, %v2725_v9  ;;  %v126_v27 = vmul.f32 %v2742_v19, %v2718_v8  ;;  %v129_v29 = vmul.f32 %v2746_v22, %v2735_v14  ;;  %v128_v30 = vmul.f32 %v2748_v23, %v2728_v11  ;;  %740 = vrot.lane.b32.xlu0 %v2716_v7, %s2655_s7  ;;  %p2627_p5 = por %p2626_p4, %p2625_p3 }
  0x31   :  { %v87_v31 = vmul.f32 %v2725_v9, %v2750_v24  ;;  %v89_v33 = vmul.f32 %v2735_v14, %v2760_v28  ;;  %742 = vrot.lane.b32.xlu1 %v2731_v13, %s2655_s7  ;;  %v485_v48 = vrot.slane %v2718_v8, %v484_v46  ;;  %v493_v49 = vrot.slane %v2728_v11, %v484_v46 }
  0x32   :  { %2443 = vmatprep.subr.msk.mxu0 %vm141_vm0, %v127_v26  ;;  %2447 = vmatprep.subr.msk.mxu1 %vm141_vm0, %v129_v29  ;;  %v86_v54 = vmul.f32 %v2768_v32, %v2718_v8  ;;  %v88_v55 = vmul.f32 %v2773_v34, %v2728_v11  ;;  %v481_v56 = vrot.slane %v2718_v8, %v480_v47  ;;  %vm2424_vm3 = vcmp.lt.s32.totalorder %v46_v0, 512  ;;  %p2628_p6 = pnand %p2627_p5, %p2621_p2 }
  0x33   :  { %2444 = vmatpush1.msk.msra.mxu0 %vm141_vm0, %v126_v27  ;;  %2448 = vmatpush1.msk.msra.mxu1 %vm141_vm0, %v128_v30  ;;  %v2804_v50 = vrot.slane %v485_v48, %v480_v47  ;;  %v2806_v51 = vrot.slane %v493_v49, %v480_v47  ;;  %v489_v57 = vrot.slane %v2728_v11, %v480_v47 }
  0x34   :  { %2451 = vmatprep.subr.msk.mxu0 %vm141_vm0, %v87_v31  ;;  %2455 = vmatprep.subr.msk.mxu1 %vm141_vm0, %v89_v33  ;;  %v707_v61 = vrot.slane %v2718_v8, %v706_v52  ;;  %v715_v62 = vrot.slane %v2728_v11, %v706_v52  ;;  %v2828_v63 = vrot.slane %v481_v56, %v480_v47 }
  0x35   :  { %1000 = vrot.lane.b32.xlu1 %v2782_v35, %s2654_s6  ;;  %929 = vperm.xlu0 %2572, %v43_v36   ;;  %v515_v59 = vmul.f32 %v2804_v50, %v2725_v9  ;;  %v517_v60 = vmul.f32 %v2806_v51, %v2735_v14  ;;  %v2830_v3 = vrot.slane %v489_v57, %v480_v47 }
  0x36   :  { %v2834_v5 = vrot.slane %v707_v61, %v702_v53  ;;  %v2836_v6 = vrot.slane %v715_v62, %v702_v53  ;;  %v514_v10 = vmul.f32 %v2828_v63, %v2718_v8  ;;  %v703_v15 = vrot.slane %v2718_v8, %v702_v53 }
  0x37   :  { %v516_v12 = vmul.f32 %v2830_v3, %v2728_v11  ;;  %v711_v16 = vrot.slane %v2728_v11, %v702_v53 }
  0x38   :  { %v737_v17 = vmul.f32 %v2834_v5, %v2725_v9  ;;  %v739_v20 = vmul.f32 %v2836_v6, %v2735_v14  ;;  %v2860_v21 = vrot.slane %v703_v15, %v702_v53 }
  0x39   :  { %1002 = vrot.lane.b32.xlu1 %v2786_v38, %s2654_s6  ;;  %1325 = vrot.lane.b32.xlu0 %v2782_v35, %s2657_s8  ;;  %v2862_v9 = vrot.slane %v711_v16, %v702_v53 }
  0x3b   :  { %v738_v14 = vmul.f32 %v2862_v9, %v2728_v11 }
  0x3d   :  { %1327 = vrot.lane.b32.xlu1 %v2786_v38, %s2657_s8  ;;  %1499 = vrot.lane.b32.xlu0 %v2782_v35, %s2658_s9 }
  0x41   :  { %1501 = vrot.lane.b32.xlu1 %v2786_v38, %s2658_s9  ;;  %1676 = vperm.xlu0 %2572, %v989_v39  }
  0x45   :  { %1744 = vrot.lane.b32.xlu1 %v2794_v40, %s2654_s6  ;;  %2038 = vrot.lane.b32.xlu0 %v2794_v40, %s2657_s8 }
  0x49   :  { %2192 = vrot.lane.b32.xlu1 %v2794_v40, %s2658_s9  ;;  %924 = vperm.xlu0 %2572, %v42_v41  }
  0x4d   :  { %1671 = vperm.xlu1 %2573, %v988_v42   ;;  %2344 = vperm.xlu0 %2572, %v1734_v43  }
  0x51   :  { %951 = vperm.xlu1 %2573, %v948_v44   ;;  %1698 = vperm.xlu0 %2572, %v1695_v45  }
  0x9a   :  { %v133_v58 = vpop.permute.xlu0 %132  ;;  %v519_v25 = vpop.permute.xlu1 %518 }
  0x9b   :  { %2445 = vmatmul.mubr.msk.f32.vlgmr.msra.gmra.mrb[0].mxu0 %vm136_vm1, %v133_v58  ;;  %2449 = vmatmul.mubr.msk.f32.vlgmr.msra.gmra.mrb[0].mxu1 %vm136_vm1, %v133_v58 }
  0x9c   :  { %224 = vmatprep.mubr.f32.mxu0 %v2652_v1  ;;  %301 = vmatprep.mubr.f32.mxu1 %v2652_v1 }
  0x9d   :  { %2452 = vmatpush1.msk.msra.mxu0 %vm141_vm0, %v86_v54  ;;  %2456 = vmatpush1.msk.msra.mxu1 %vm141_vm0, %v88_v55 }
  0x9e   :  { %v135_v4 = vpop.permute.xlu0 %134  ;;  %2459 = vmatprep.subr.msk.mxu0 %vm141_vm0, %v515_v59  ;;  %2463 = vmatprep.subr.msk.mxu1 %vm141_vm0, %v517_v60 }
  0x9f   :  { %2446 = vmatmul.mubr.msk.f32.gmra.mrb[2].mxu0 %vm136_vm1, %v135_v4  ;;  %2450 = vmatmul.mubr.msk.f32.gmra.mrb[2].mxu1 %vm136_vm1, %v135_v4  ;;  %v521_v26 = vpop.permute.xlu1 %520 }
  0xa0   :  { %388 = vmatprep.mubr.f32.mxu0 %v2652_v1  ;;  %465 = vmatprep.mubr.f32.mxu1 %v2652_v1 }
  0xa3   :  { %2453 = vmatmul.mubr.msk.f32.vlgmr.msra.gmra.mrb[0].mxu0 %vm136_vm1, %v2716_v7  ;;  %2457 = vmatmul.mubr.msk.f32.vlgmr.msra.gmra.mrb[0].mxu1 %vm136_vm1, %v2716_v7  ;;  %v736_v7 = vmul.f32 %v2860_v21, %v2718_v8  ;;  %v741_v8 = vpop.permute.xlu0 %740  ;;  %v743_v11 = vpop.permute.xlu1 %742 }
  0xa4   :  { %394 = vmatprep.mubr.f32.mxu0 %v2652_v1  ;;  %471 = vmatprep.mubr.f32.mxu1 %v2652_v1 }
  0xa5   :  { %2460 = vmatpush1.msk.msra.mxu0 %vm141_vm0, %v514_v10  ;;  %2464 = vmatpush1.msk.msra.mxu1 %vm141_vm0, %v516_v12 }
  0xa6   :  { %2467 = vmatprep.subr.msk.mxu0 %vm141_vm0, %v737_v17  ;;  %2471 = vmatprep.subr.msk.mxu1 %vm141_vm0, %v739_v20 }
  0xa7   :  { %2454 = vmatmul.mubr.msk.f32.gmra.mrb[2].mxu0 %vm136_vm1, %v2731_v13  ;;  %2458 = vmatmul.mubr.msk.f32.gmra.mrb[2].mxu1 %vm136_vm1, %v2731_v13  ;;  %v1001_v55 = vpop.permute.xlu1 %1000 }
  0xa8   :  { %602 = vmatprep.mubr.f32.mxu0 %v2652_v1  ;;  %679 = vmatprep.mubr.f32.mxu1 %v2652_v1 }
  0xab   :  { %2461 = vmatmul.mubr.msk.f32.vlgmr.msra.gmra.mrb[0].mxu0 %vm136_vm1, %v519_v25  ;;  %2465 = vmatmul.mubr.msk.f32.vlgmr.msra.gmra.mrb[0].mxu1 %vm136_vm1, %v519_v25  ;;  %v1003_v62 = vpop.permute.xlu1 %1002 }
  0xac   :  { %608 = vmatprep.mubr.f32.mxu0 %v2652_v1  ;;  %685 = vmatprep.mubr.f32.mxu1 %v2652_v1 }
  0xad   :  { %2468 = vmatpush1.msk.msra.mxu0 %vm141_vm0, %v736_v7  ;;  %2472 = vmatpush1.msk.msra.mxu1 %vm141_vm0, %v738_v14  ;;  %v2355_v7 = vld [vmem:[#allocation5 + $0x60] sm:$0xff] }
  0xae   :  { %2358 = vperm.xlu1 %2573, %v2355_v7  }
  0xaf   :  { %2462 = vmatmul.mubr.msk.f32.gmra.mrb[2].mxu0 %vm136_vm1, %v521_v26  ;;  %2466 = vmatmul.mubr.msk.f32.gmra.mrb[2].mxu1 %vm136_vm1, %v521_v26 }
  0xb0   :  { %824 = vmatprep.mubr.f32.mxu0 %v2652_v1  ;;  %901 = vmatprep.mubr.f32.mxu1 %v2652_v1 }
  0xb3   :  { %2469 = vmatmul.mubr.msk.f32.vlgmr.msra.gmra.mrb[0].mxu0 %vm136_vm1, %v741_v8  ;;  %2473 = vmatmul.mubr.msk.f32.vlgmr.msra.gmra.mrb[0].mxu1 %vm136_vm1, %v741_v8 }
  0xb4   :  { %830 = vmatprep.mubr.f32.mxu0 %v2652_v1  ;;  %907 = vmatprep.mubr.f32.mxu1 %v2652_v1  ;;  %v930_v31 = vpop.permute.xlu0 %929 }
  0xb7   :  { %2470 = vmatmul.mubr.msk.f32.gmra.mrb[2].mxu0 %vm136_vm1, %v743_v11  ;;  %2474 = vmatmul.mubr.msk.f32.gmra.mrb[2].mxu1 %vm136_vm1, %v743_v11 }
  0xb8   :  { %1073 = vmatprep.mubr.f32.mxu0 %v2652_v1  ;;  %1150 = vmatprep.mubr.f32.mxu1 %v2652_v1 }
 0x186   :  { %v2894_v13 = vpop.f32.mrb[0].mxu0  ;;  %v2896_v27 = vpop.f32.mrb[0].mxu1 }
 0x187   :  { %v2898_v29 = vpop.f32.mrb[1].mxu0  ;;  %v2900_v30 = vpop.f32.mrb[1].mxu1 }
 0x18a   :  { %v832_v33 = vpop.f32.mrb[2].mxu0  ;;  %v909_v36 = vpop.f32.mrb[2].mxu1 }
 0x18b   :  { %v936_v37 = vadd.f32 %v930_v31, %v832_v33  ;;  %v938_v39 = vadd.f32 %v930_v31, %v909_v36  ;;  %v834_v41 = vpop.f32.mrb[3].mxu0  ;;  %v911_v42 = vpop.f32.mrb[3].mxu1 }
 0x18c   :  { %v937_v43 = vadd.f32 %v930_v31, %v834_v41  ;;  %v939_v44 = vadd.f32 %v930_v31, %v911_v42 }
 0x18d   :  { %v944_v45 = vmax.f32 %v936_v37, 0.0  ;;  %v946_v46 = vmax.f32 %v938_v39, 0.0 }
 0x18e   :  { %v945_v47 = vmax.f32 %v937_v43, 0.0  ;;  %v947_v48 = vmax.f32 %v939_v44, 0.0 }
 0x18f   :  { %v994_v53 = vmul.f32 %v944_v45, %v2742_v19  ;;  %v996_v54 = vmul.f32 %v946_v46, %v2748_v23  ;;  %v990_v58 = vmul.f32 %v944_v45, %v2768_v32  ;;  %v992_v59 = vmul.f32 %v946_v46, %v2773_v34 }
 0x190   :  { %v995_v49 = vmul.f32 %v945_v47, %v2740_v18  ;;  %v997_v52 = vmul.f32 %v947_v48, %v2746_v22  ;;  %v991_v56 = vmul.f32 %v945_v47, %v2750_v24  ;;  %v993_v57 = vmul.f32 %v947_v48, %v2760_v28 }
 0x191   :  { %v1322_v60 = vmul.f32 %v945_v47, %v2804_v50  ;;  %v1324_v61 = vmul.f32 %v947_v48, %v2806_v51  ;;  %v1321_v4 = vmul.f32 %v944_v45, %v2828_v63  ;;  %v1323_v10 = vmul.f32 %v946_v46, %v2830_v3 }
 0x192   :  { %1009 = vmatprep.subr.mxu0 %v995_v49  ;;  %1086 = vmatprep.subr.mxu1 %v997_v52  ;;  %v1496_v12 = vmul.f32 %v945_v47, %v2834_v5  ;;  %v1498_v15 = vmul.f32 %v947_v48, %v2836_v6  ;;  %v1495_v16 = vmul.f32 %v944_v45, %v2860_v21 }
 0x193   :  { %1010 = vmatpush1.msra.mxu0 %v994_v53  ;;  %1087 = vmatpush1.msra.mxu1 %v996_v54  ;;  %v1497_v17 = vmul.f32 %v946_v46, %v2862_v9 }
 0x194   :  { %2475 = vmatmul.mubr.msk.f32.vlgmr.msra.gmra.mrb[4].mxu0 %vm1004_vm2, %v1001_v55  ;;  %2477 = vmatmul.mubr.msk.f32.vlgmr.msra.gmra.mrb[4].mxu1 %vm1004_vm2, %v1001_v55 }
 0x195   :  { %1167 = vmatprep.subr.mxu0 %v991_v56  ;;  %1244 = vmatprep.subr.mxu1 %v993_v57 }
 0x196   :  { %1168 = vmatpush1.msra.mxu0 %v990_v58  ;;  %1245 = vmatpush1.msra.mxu1 %v992_v59 }
 0x197   :  { %1333 = vmatprep.subr.mxu0 %v1322_v60  ;;  %1410 = vmatprep.subr.mxu1 %v1324_v61 }
 0x198   :  { %1079 = vmatprep.mubr.f32.mxu0 %v2652_v1  ;;  %1156 = vmatprep.mubr.f32.mxu1 %v2652_v1 }
 0x199   :  { %2476 = vmatmul.mubr.msk.f32.gmra.mrb[6].mxu0 %vm1004_vm2, %v1003_v62  ;;  %2478 = vmatmul.mubr.msk.f32.gmra.mrb[6].mxu1 %vm1004_vm2, %v1003_v62 }
 0x19a   :  { %1231 = vmatprep.mubr.f32.mxu0 %v2652_v1  ;;  %1308 = vmatprep.mubr.f32.mxu1 %v2652_v1 }
 0x19d   :  { %2479 = vmatmul.mubr.msk.f32.vlgmr.msra.gmra.mrb[4].mxu0 %vm1004_vm2, %v2782_v35  ;;  %2481 = vmatmul.mubr.msk.f32.vlgmr.msra.gmra.mrb[4].mxu1 %vm1004_vm2, %v2782_v35  ;;  %v1326_v35 = vpop.permute.xlu0 %1325 }
 0x19e   :  { %1334 = vmatpush1.msra.mxu0 %v1321_v4  ;;  %1411 = vmatpush1.msra.mxu1 %v1323_v10 }
 0x19f   :  { %1507 = vmatprep.subr.mxu0 %v1496_v12  ;;  %1584 = vmatprep.subr.mxu1 %v1498_v15 }
 0x1a0   :  { %1237 = vmatprep.mubr.f32.mxu0 %v2652_v1  ;;  %1314 = vmatprep.mubr.f32.mxu1 %v2652_v1 }
 0x1a1   :  { %2480 = vmatmul.mubr.msk.f32.gmra.mrb[6].mxu0 %vm1004_vm2, %v2786_v38  ;;  %2482 = vmatmul.mubr.msk.f32.gmra.mrb[6].mxu1 %vm1004_vm2, %v2786_v38  ;;  %v1328_v38 = vpop.permute.xlu1 %1327  ;;  %v1500_v20 = vpop.permute.xlu0 %1499 }
 0x1a2   :  { %1397 = vmatprep.mubr.f32.mxu0 %v2652_v1  ;;  %1474 = vmatprep.mubr.f32.mxu1 %v2652_v1 }
 0x1a5   :  { %2483 = vmatmul.mubr.msk.f32.vlgmr.msra.gmra.mrb[4].mxu0 %vm1004_vm2, %v1326_v35  ;;  %2485 = vmatmul.mubr.msk.f32.vlgmr.msra.gmra.mrb[4].mxu1 %vm1004_vm2, %v1326_v35  ;;  %v1502_v25 = vpop.permute.xlu1 %1501  ;;  %v1677_v14 = vpop.permute.xlu0 %1676 }
 0x1a6   :  { %1508 = vmatpush1.msra.mxu0 %v1495_v16  ;;  %1585 = vmatpush1.msra.mxu1 %v1497_v17 }
 0x1a7   :  { %1403 = vmatprep.mubr.f32.mxu0 %v2652_v1  ;;  %1480 = vmatprep.mubr.f32.mxu1 %v2652_v1 }
 0x1a9   :  { %2484 = vmatmul.mubr.msk.f32.gmra.mrb[6].mxu0 %vm1004_vm2, %v1328_v38  ;;  %2486 = vmatmul.mubr.msk.f32.gmra.mrb[6].mxu1 %vm1004_vm2, %v1328_v38  ;;  %v2954_v26 = vpop.permute.xlu1 %1744  ;;  %v2956_v8 = vpop.permute.xlu0 %2038 }
 0x1aa   :  { %1571 = vmatprep.mubr.f32.mxu0 %v2652_v1  ;;  %1648 = vmatprep.mubr.f32.mxu1 %v2652_v1 }
 0x1ad   :  { %2487 = vmatmul.mubr.msk.f32.vlgmr.msra.gmra.mrb[4].mxu0 %vm1004_vm2, %v1500_v20  ;;  %2489 = vmatmul.mubr.msk.f32.vlgmr.msra.gmra.mrb[4].mxu1 %vm1004_vm2, %v1500_v20  ;;  %v2958_v11 = vpop.permute.xlu1 %2192  ;;  %v925_v31 = vpop.permute.xlu0 %924 }
 0x1ae   :  { %1577 = vmatprep.mubr.f32.mxu0 %v2652_v1  ;;  %1654 = vmatprep.mubr.f32.mxu1 %v2652_v1  ;;  %v932_v36 = vadd.f32 %v925_v31, %v2894_v13  ;;  %v934_v37 = vadd.f32 %v925_v31, %v2896_v27  ;;  %v933_v39 = vadd.f32 %v925_v31, %v2898_v29 }
 0x1af   :  { %v935_v41 = vadd.f32 %v925_v31, %v2900_v30 }
 0x1b0   :  { %v940_v42 = vmax.f32 %v932_v36, 0.0  ;;  %v942_v43 = vmax.f32 %v934_v37, 0.0  ;;  %v941_v44 = vmax.f32 %v933_v39, 0.0 }
 0x1b1   :  { %2488 = vmatmul.mubr.msk.f32.gmra.mrb[6].mxu0 %vm1004_vm2, %v1502_v25  ;;  %2490 = vmatmul.mubr.msk.f32.gmra.mrb[6].mxu1 %vm1004_vm2, %v1502_v25  ;;  %v1672_v33 = vpop.permute.xlu1 %1671  ;;  %v943_v45 = vmax.f32 %v935_v41, 0.0  ;;  %v2964_v29 = vpop.permute.xlu0 %2344 }
 0x1b2   :  { %1812 = vmatprep.mubr.f32.mxu0 %v2652_v1  ;;  %1883 = vmatprep.mubr.f32.mxu1 %v2652_v1 }
 0x1b5   :  { %v952_v46 = vpop.permute.xlu1 %951  ;;  %v1699_v25 = vpop.permute.xlu0 %1698 }
 0x1b6   :  { %v954_v47 = vmul.f32 %v952_v46, %v940_v42  ;;  %v956_v48 = vmul.f32 %v952_v46, %v942_v43  ;;  %v955_v49 = vmul.f32 %v952_v46, %v941_v44  ;;  %v957_v52 = vmul.f32 %v952_v46, %v943_v45 }
 0x1b8   :  { %v958_v53 = vrot.slane %v954_v47, 4  ;;  %v970_v54 = vrot.slane %v956_v48, 4  ;;  %v964_v55 = vrot.slane %v955_v49, 4  ;;  %v976_v56 = vrot.slane %v957_v52, 4 }
 0x1ba   :  { %v959_v13 = vadd.f32 %v958_v53, %v954_v47  ;;  %v971_v57 = vadd.f32 %v970_v54, %v956_v48  ;;  %v965_v27 = vadd.f32 %v964_v55, %v955_v49  ;;  %v977_v58 = vadd.f32 %v976_v56, %v957_v52 }
 0x1bc   :  { %v960_v30 = vrot.slane %v959_v13, 2  ;;  %v972_v59 = vrot.slane %v971_v57, 2  ;;  %v966_v60 = vrot.slane %v965_v27, 2  ;;  %v978_v61 = vrot.slane %v977_v58, 2 }
 0x1be   :  { %v2966_v38 = vadd.f32 %v960_v30, %v959_v13  ;;  %v2968_v20 = vadd.f32 %v972_v59, %v971_v57  ;;  %v2970_v36 = vadd.f32 %v966_v60, %v965_v27  ;;  %v2972_v37 = vadd.f32 %v978_v61, %v977_v58 }
 0x1c0   :  { %v962_v60 = vrot.slane %v2966_v38, 1  ;;  %v974_v61 = vrot.slane %v2968_v20, 1 }
 0x280   :  { %v1573_v62 = vpop.f32.mrb[4].mxu0  ;;  %v1650_v4 = vpop.f32.mrb[4].mxu1 }
 0x281   :  { %v1679_v10 = vadd.f32 %v1672_v33, %v1573_v62  ;;  %v1681_v12 = vadd.f32 %v1672_v33, %v1650_v4  ;;  %v1575_v15 = vpop.f32.mrb[5].mxu0  ;;  %v1652_v35 = vpop.f32.mrb[5].mxu1 }
 0x282   :  { %v1680_v16 = vadd.f32 %v1672_v33, %v1575_v15  ;;  %v1682_v17 = vadd.f32 %v1672_v33, %v1652_v35 }
 0x283   :  { %v1687_v7 = vmax.f32 %v1679_v10, 0.0  ;;  %v1689_v31 = vmax.f32 %v1681_v12, 0.0 }
 0x284   :  { %v1688_v39 = vmax.f32 %v1680_v16, 0.0  ;;  %v1690_v41 = vmax.f32 %v1682_v17, 0.0  ;;  %v1579_v42 = vpop.f32.mrb[6].mxu0  ;;  %v1656_v43 = vpop.f32.mrb[6].mxu1 }
 0x285   :  { %v1701_v44 = vmul.f32 %v1699_v25, %v1687_v7  ;;  %v1703_v45 = vmul.f32 %v1699_v25, %v1689_v31  ;;  %v1683_v46 = vadd.f32 %v1677_v14, %v1579_v42  ;;  %v1685_v47 = vadd.f32 %v1677_v14, %v1656_v43  ;;  %v1581_v33 = vpop.f32.mrb[7].mxu0  ;;  %v1658_v48 = vpop.f32.mrb[7].mxu1 }
 0x286   :  { %v1702_v49 = vmul.f32 %v1699_v25, %v1688_v39  ;;  %v1704_v52 = vmul.f32 %v1699_v25, %v1690_v41  ;;  %v1684_v53 = vadd.f32 %v1677_v14, %v1581_v33  ;;  %v1686_v54 = vadd.f32 %v1677_v14, %v1658_v48 }
 0x287   :  { %v1705_v55 = vrot.slane %v1701_v44, 4  ;;  %v1717_v56 = vrot.slane %v1703_v45, 4  ;;  %v2974_v13 = vmax.f32 %v1683_v46, 0.0  ;;  %v2976_v57 = vmax.f32 %v1685_v47, 0.0 }
 0x288   :  { %v1711_v27 = vrot.slane %v1702_v49, 4  ;;  %v1723_v58 = vrot.slane %v1704_v52, 4  ;;  %v1692_v30 = vmax.f32 %v1684_v53, 0.0  ;;  %v1694_v59 = vmax.f32 %v1686_v54, 0.0 }
 0x289   :  { %v1706_v62 = vadd.f32 %v1705_v55, %v1701_v44  ;;  %v1718_v4 = vadd.f32 %v1717_v56, %v1703_v45  ;;  %v1739_v17 = vmul.f32 %v2974_v13, %v2742_v19  ;;  %v1741_v25 = vmul.f32 %v2976_v57, %v2748_v23 }
 0x28a   :  { %v1712_v10 = vadd.f32 %v1711_v27, %v1702_v49  ;;  %v1724_v12 = vadd.f32 %v1723_v58, %v1704_v52  ;;  %v1740_v14 = vmul.f32 %v1692_v30, %v2740_v18  ;;  %v1742_v15 = vmul.f32 %v1694_v59, %v2746_v22 }
 0x28b   :  { %v1707_v35 = vrot.slane %v1706_v62, 2  ;;  %v1719_v16 = vrot.slane %v1718_v4, 2  ;;  %v1736_v39 = vmul.f32 %v1692_v30, %v2750_v24  ;;  %v1738_v41 = vmul.f32 %v1694_v59, %v2760_v28 }
 0x28c   :  { %v1713_v7 = vrot.slane %v1712_v10, 2  ;;  %v1725_v31 = vrot.slane %v1724_v12, 2  ;;  %1748 = vmatprep.subr.mxu0 %v1740_v14  ;;  %1819 = vmatprep.subr.mxu1 %v1742_v15  ;;  %v968_v18 = vrot.slane %v2970_v36, 1  ;;  %v1735_v19 = vmul.f32 %v2974_v13, %v2768_v32 }
 0x28d   :  { %v1708_v42 = vadd.f32 %v1707_v35, %v1706_v62  ;;  %v1720_v22 = vadd.f32 %v1719_v16, %v1718_v4  ;;  %1749 = vmatpush1.msra.mxu0 %v1739_v17  ;;  %1820 = vmatpush1.msra.mxu1 %v1741_v25  ;;  %v980_v43 = vrot.slane %v2972_v37, 1  ;;  %v1737_v24 = vmul.f32 %v2976_v57, %v2773_v34 }
 0x28e   :  { %v1714_v23 = vadd.f32 %v1713_v7, %v1712_v10  ;;  %v1726_v44 = vadd.f32 %v1725_v31, %v1724_v12  ;;  %2491 = vmatmul.mubr.msk.f32.vlgmr.msra.gmra.mrb[8].mxu0 %vm1004_vm2, %v2954_v26  ;;  %2492 = vmatmul.mubr.msk.f32.vlgmr.msra.gmra.mrb[8].mxu1 %vm1004_vm2, %v2954_v26  ;;  %v2035_v46 = vmul.f32 %v1692_v30, %v2804_v50 }
 0x28f   :  { %v1709_v28 = vrot.slane %v1708_v42, 1  ;;  %v1721_v45 = vrot.slane %v1720_v22, 1  ;;  %1892 = vmatprep.subr.mxu0 %v1736_v39  ;;  %1963 = vmatprep.subr.mxu1 %v1738_v41  ;;  %v2037_v32 = vmul.f32 %v1694_v59, %v2806_v51  ;;  %v963_v47 = vadd.f32 %v962_v60, %v2966_v38  ;;  %v2359_v60 = vpop.permute.xlu1 %2358 }
 0x290   :  { %v975_v33 = vadd.f32 %v974_v61, %v2968_v20  ;;  %v1715_v48 = vrot.slane %v1714_v23, 1  ;;  %v1727_v49 = vrot.slane %v1726_v44, 1  ;;  %1893 = vmatpush1.msra.mxu0 %v1735_v19  ;;  %1964 = vmatpush1.msra.mxu1 %v1737_v24  ;;  %v969_v26 = vadd.f32 %v968_v18, %v2970_v36 }
 0x291   :  { %v1710_v52 = vadd.f32 %v1709_v28, %v1708_v42  ;;  %v1722_v34 = vadd.f32 %v1721_v45, %v1720_v22  ;;  %2042 = vmatprep.subr.mxu0 %v2035_v46  ;;  %2113 = vmatprep.subr.mxu1 %v2037_v32  ;;  %v981_v53 = vadd.f32 %v980_v43, %v2972_v37  ;;  %v2659_v41 = vmov 1966171168  }
 0x292   :  { %v1716_v54 = vadd.f32 %v1715_v48, %v1714_v23  ;;  %v1728_v50 = vadd.f32 %v1727_v49, %v1726_v44  ;;  %1956 = vmatprep.mubr.f32.mxu0 %v2652_v1  ;;  %2027 = vmatprep.mubr.f32.mxu1 %v2652_v1  ;;  %v2034_v36 = vmul.f32 %v2974_v13, %v2828_v63  ;;  %v2400_v18 = vunpack.c.l.s4 %v2659_v41 }
 0x293   :  { %v3006_v51 = vadd.f32 %v1710_v52, %v963_v47  ;;  %v3008_v38 = vadd.f32 %v1722_v34, %v975_v33  ;;  %v2036_v37 = vmul.f32 %v2976_v57, %v2830_v3  ;;  %v2189_v56 = vmul.f32 %v1692_v30, %v2834_v5 }
 0x294   :  { %v3010_v20 = vadd.f32 %v1716_v54, %v969_v26  ;;  %v3012_v55 = vadd.f32 %v1728_v50, %v981_v53  ;;  %v2191_v27 = vmul.f32 %v1694_v59, %v2836_v6  ;;  %v2188_v63 = vmul.f32 %v2974_v13, %v2860_v21 }
 0x295   :  { %v2190_v3 = vmul.f32 %v2976_v57, %v2862_v9  ;;  %v2401_v45 = vunpack.c.0.s8 %v2400_v18 }
 0x296   :  { %2493 = vmatmul.mubr.msk.f32.vlgmr.msra.gmra.mrb[8].mxu0 %vm1004_vm2, %v2794_v40  ;;  %2494 = vmatmul.mubr.msk.f32.vlgmr.msra.gmra.mrb[8].mxu1 %vm1004_vm2, %v2794_v40 }
 0x297   :  { %2043 = vmatpush1.msra.mxu0 %v2034_v36  ;;  %2114 = vmatpush1.msra.mxu1 %v2036_v37  ;;  %v2404_v34 = vsub.s32 %v2401_v45, %v2710_v2 }
 0x298   :  { %2196 = vmatprep.subr.mxu0 %v2189_v56  ;;  %2267 = vmatprep.subr.mxu1 %v2191_v27 }
 0x299   :  { %2106 = vmatprep.mubr.f32.mxu0 %v2652_v1  ;;  %2177 = vmatprep.mubr.f32.mxu1 %v2652_v1 }
 0x29e   :  { %2495 = vmatmul.mubr.msk.f32.vlgmr.msra.gmra.mrb[8].mxu0 %vm1004_vm2, %v2956_v8  ;;  %2496 = vmatmul.mubr.msk.f32.vlgmr.msra.gmra.mrb[8].mxu1 %vm1004_vm2, %v2956_v8 }
 0x29f   :  { %2197 = vmatpush1.msra.mxu0 %v2188_v63  ;;  %2268 = vmatpush1.msra.mxu1 %v2190_v3 }
 0x2a0   :  { %2260 = vmatprep.mubr.f32.mxu0 %v2652_v1  ;;  %2331 = vmatprep.mubr.f32.mxu1 %v2652_v1 }
 0x2a6   :  { %2497 = vmatmul.mubr.msk.f32.vlgmr.msra.gmra.mrb[8].mxu0 %vm1004_vm2, %v2958_v11  ;;  %2498 = vmatmul.mubr.msk.f32.vlgmr.msra.gmra.mrb[8].mxu1 %vm1004_vm2, %v2958_v11 }
 0x379   :  { %v2262_v40 = vpop.f32.mrb[8].mxu0  ;;  %v2333_v5 = vpop.f32.mrb[8].mxu1 }
 0x37a   :  { %v2347_v6 = vadd.f32 %v2964_v29, %v2262_v40  ;;  %v2349_v21 = vadd.f32 %v2964_v29, %v2333_v5  ;;  %v2264_v9 = vpop.f32.mrb[9].mxu0  ;;  %v2335_v8 = vpop.f32.mrb[9].mxu1 }
 0x37b   :  { %v2348_v13 = vadd.f32 %v2964_v29, %v2264_v9  ;;  %v2350_v57 = vadd.f32 %v2964_v29, %v2335_v8 }
 0x37c   :  { %v2351_v58 = vmax.f32 %v2347_v6, 0.0  ;;  %v2353_v1 = vmax.f32 %v2349_v21, 0.0 }
 0x37d   :  { %v2352_v30 = vmax.f32 %v2348_v13, 0.0  ;;  %v2354_v59 = vmax.f32 %v2350_v57, 0.0 }
 0x37e   :  { %v2361_v61 = vmul.f32 %v2359_v60, %v2351_v58  ;;  %v2363_v62 = vmul.f32 %v2359_v60, %v2353_v1 }
 0x37f   :  { %v2362_v11 = vmul.f32 %v2359_v60, %v2352_v30  ;;  %v2364_v4 = vmul.f32 %v2359_v60, %v2354_v59 }
 0x380   :  { %v2365_v10 = vrot.slane %v2361_v61, 4  ;;  %v2377_v12 = vrot.slane %v2363_v62, 4 }
 0x381   :  { %v2371_v14 = vrot.slane %v2362_v11, 4  ;;  %v2383_v15 = vrot.slane %v2364_v4, 4 }
 0x382   :  { %v2366_v35 = vadd.f32 %v2365_v10, %v2361_v61  ;;  %v2378_v16 = vadd.f32 %v2377_v12, %v2363_v62 }
 0x383   :  { %v2372_v17 = vadd.f32 %v2371_v14, %v2362_v11  ;;  %v2384_v25 = vadd.f32 %v2383_v15, %v2364_v4 }
 0x384   :  { %v2367_v7 = vrot.slane %v2366_v35, 2  ;;  %v2379_v31 = vrot.slane %v2378_v16, 2 }
 0x385   :  { %v2373_v29 = vrot.slane %v2372_v17, 2  ;;  %v2385_v39 = vrot.slane %v2384_v25, 2 }
 0x386   :  { %v2368_v42 = vadd.f32 %v2367_v7, %v2366_v35  ;;  %v2380_v22 = vadd.f32 %v2379_v31, %v2378_v16 }
 0x387   :  { %v2374_v19 = vadd.f32 %v2373_v29, %v2372_v17  ;;  %v2386_v43 = vadd.f32 %v2385_v39, %v2384_v25 }
 0x388   :  { %v2369_v23 = vrot.slane %v2368_v42, 1  ;;  %v2381_v44 = vrot.slane %v2380_v22, 1 }
 0x389   :  { %v2375_v24 = vrot.slane %v2374_v19, 1  ;;  %v2387_v28 = vrot.slane %v2386_v43, 1 }
 0x38a   :  { %v2370_v46 = vadd.f32 %v2369_v23, %v2368_v42  ;;  %v2382_v32 = vadd.f32 %v2381_v44, %v2380_v22 }
 0x38b   :  { %v2376_v47 = vadd.f32 %v2375_v24, %v2374_v19  ;;  %v2388_v33 = vadd.f32 %v2387_v28, %v2386_v43 }
 0x38c   :  { %v2389_v48 = vadd.f32 %v2370_v46, %v3006_v51  ;;  %v2391_v49 = vadd.f32 %v2382_v32, %v3008_v38 }
 0x38d   :  { %v2390_v26 = vadd.f32 %v2376_v47, %v3010_v20  ;;  %v2392_v52 = vadd.f32 %v2388_v33, %v3012_v55 }
 0x38f   :  { %v2397_v53 = vcombine.low %v2389_v48, %v2390_v26  ;;  %v2398_v54 = vcombine.low %v2391_v49, %v2392_v52 }
 0x391   :  { %v2405_v50 = vrot.slane %v2397_v53, %v2404_v34  ;;  %v2412_v36 = vrot.slane %v2398_v54, %v2404_v34 }
 0x393   :  { %v2413_v37 = vcombine.low %v2405_v50, %v2412_v36 }
 0x395   :  { %v2420_v56 = vrot.slane %v2413_v37, %v2404_v34 }
 0x397   :  { %2426 = vst.msk [vmem:[#allocation7] sm:$0xf] %vm2424_vm3, %v2420_v56 }
 0x398   :  { %2631 = shalt.err (!%p2628_p6)
}
 0x399   :  { %s2632_s15 = scalar_lea.hbm %s3064_s2, 64 }
 0x39a   :  { %p2633_p7 = scmp.ne.s32.totalorder %s3064_s2, %s2632_s15  ;;  %p2636_p8 = scmp.lt.u32.totalorder %s2632_s15, %s3064_s2 }
 0x39c   :  { %p2638_p9 = pnand %p2636_p8, %p2633_p7 }
 0x39e   :  { %2641 = shalt.err (!%p2638_p9)
}
 0x39f   :  { %2436 = dma.vmem_to_hbm [thread:$0]  %s2434_s11, 64, %s3064_s2, [#allocation4]  }
 0x3a0   :  { %2646 = dma.done.wait [#allocation4], 64  }
 0x3a1   :  { %2647 = vsyncadd [#allocation4], 4294967232 }
 0x3a2   :  { %2440 = vsyncpa [#allocation3], 1 }
 0x3a3   :  { %2441 = vsyncpa [#allocation6], 1 }
 0x3a4   :  { %2442 = vsyncpa [#allocation4], 1 }

</bundles_post_ra>
